<compile_context>
chip_gen: v6e
topology: v6e:2x2x1
jax: 0.10.0
libtpu: 0.0.40
codegen_flags: <defaults>
</compile_context>

<pallas_src>
import math

import numpy as np
import jax
import jax.numpy as jnp
from jax.experimental import pallas as pl
from jax.experimental.pallas import tpu as pltpu


def _pos_embedding_kernel(base_sin_ref, base_cos_ref, row_cos_ref, row_sin_ref, o_ref):
    """Combine per-tile base angle with per-row deltas; one full-width store.

    base_sin_ref : (1, dim)   sin(b*w + phase)  for this tile (b = tile*TL)
    base_cos_ref : (1, dim)   cos(b*w + phase)
    row_cos_ref  : (TL, dim)  cos(r*w)  (duplicated across both halves)
    row_sin_ref  : (TL, dim)  sin(r*w)
    o_ref        : (TL, dim)  output tile (leading batch dim squeezed)

    sin(b*w + phase + r*w) = sin(b*w+phase)*cos(r*w) + cos(b*w+phase)*sin(r*w)
    which equals sin((b+r)*w) on the first half and cos((b+r)*w) on the second.
    """
    o_ref[...] = (base_sin_ref[...] * row_cos_ref[...]
                  + base_cos_ref[...] * row_sin_ref[...])


def _choose_tile_rows(max_length, dim, budget_bytes=2 << 20):
    """Rows per tile: multiple of 8, ~budget_bytes of f32 output per block,
    and at least 2 grid programs when possible (v7x has 2 TensorCores)."""
    if max_length <= 8:
        return max_length                                # full extent -> legal
    rows = max(8, (budget_bytes // (dim * 4)) // 8 * 8)  # byte-sized, mult of 8
    # Split even single-tile tables in two so the "parallel" grid axis has
    # work for both v7x TensorCores (no effect on v5e/v6e).
    two_way = (((max_length + 1) // 2) + 7) // 8 * 8     # round_up(ceil(L/2), 8)
    return min(rows, two_way)


def _build_tables(max_length, dim, freq, tl, num_tiles):
    """Host-side (numpy float64) precompute of the constant tables, cast to f32."""
    half = dim // 2
    d = np.arange(half, dtype=np.float64) * (2.0 / (dim - 2))
    w = 1.0 / np.power(np.float64(freq), d)                      # (half,)
    w2 = np.concatenate([w, w])                                  # (dim,)
    phase = np.concatenate([np.zeros(half), np.full(half, np.pi / 2.0)])  # (dim,)

    r = np.arange(tl, dtype=np.float64)[:, None]                 # (TL, 1)
    row_ang = r * w2[None, :]                                    # (TL, dim)
    row_cos = np.cos(row_ang).astype(np.float32)
    row_sin = np.sin(row_ang).astype(np.float32)

    b = (np.arange(num_tiles, dtype=np.float64) * tl)[:, None]   # (NT, 1)
    base_ang = b * w2[None, :] + phase[None, :]                  # (NT, dim)
    base_sin = np.sin(base_ang).astype(np.float32)[:, None, :]   # (NT, 1, dim)
    base_cos = np.cos(base_ang).astype(np.float32)[:, None, :]

    return (jnp.asarray(base_sin), jnp.asarray(base_cos),
            jnp.asarray(row_cos), jnp.asarray(row_sin))


def position_embedding_table(max_length, dim, freq=10000.0):
    """Compute the (1, max_length, dim) sinusoidal table with a Pallas kernel."""
    assert dim % 2 == 0, "PositionEmbedding requires an even dim"
    assert dim >= 4, "PositionEmbedding requires dim >= 4 (dim==2 divides by zero)"

    tl = _choose_tile_rows(max_length, dim)
    num_tiles = pl.cdiv(max_length, tl)
    base_sin, base_cos, row_cos, row_sin = _build_tables(
        max_length, dim, freq, tl, num_tiles)

    cost = pl.CostEstimate(
        flops=3 * max_length * dim,                    # 2 mul + 1 add per element
        transcendentals=0,                             # all hoisted to the tables
        bytes_accessed=(max_length * dim              # output writeback
                        + 2 * tl * dim                 # resident row tables
                        + 2 * num_tiles * dim) * 4,    # per-tile base rows
    )

    return pl.pallas_call(
        _pos_embedding_kernel,
        out_shape=jax.ShapeDtypeStruct((1, max_length, dim), jnp.float32),
        grid=(num_tiles,),
        in_specs=[
            # Per-tile base rows: leading tile dim squeezed -> kernel sees (1, dim).
            pl.BlockSpec((None, 1, dim), lambda i: (i, 0, 0)),
            pl.BlockSpec((None, 1, dim), lambda i: (i, 0, 0)),
            # Row-delta tables: constant index_map -> DMA'd once, stay resident.
            pl.BlockSpec((tl, dim), lambda i: (0, 0)),
            pl.BlockSpec((tl, dim), lambda i: (0, 0)),
        ],
        # Leading size-1 batch dim squeezed -> single full-width (TL, dim) store.
        out_specs=pl.BlockSpec((None, tl, dim), lambda i: (0, i, 0)),
        compiler_params=pltpu.CompilerParams(
            dimension_semantics=("parallel",),
            vmem_limit_bytes=32 << 20),
        cost_estimate=cost,
    )(base_sin, base_cos, row_cos, row_sin)


class PositionEmbedding:
    """JAX/Pallas equivalent of the PyTorch PositionEmbedding module."""

    # TODO(synk): the torch module keeps a threading.local per-device store and
    # reuses longer cached tables; here a plain per-instance dict keyed by
    # max_length is used (same forward semantics, simpler cache policy).
    def __init__(self, dim, freq=10000.0):
        self.dim = dim
        self.freq = freq
        self._cache = {}

    def __call__(self, inputs):
        max_length = inputs.shape[1]
        tbl = self._cache.get(max_length)
        if tbl is None:
            tbl = position_embedding_table(max_length, self.dim, self.freq)
            if not isinstance(tbl, jax.core.Tracer):   # only cache concrete arrays
                self._cache[max_length] = tbl
        return tbl


def _reference_f32(max_length, dim, freq=10000.0):
    """f32 reference mirroring the PyTorch code path exactly."""
    positions = jnp.arange(0.0, max_length, dtype=jnp.float32)[:, None]
    dims = jnp.arange(0.0, dim, 2.0, dtype=jnp.float32)[None, :] / (dim - 2)
    angle = positions / jnp.power(jnp.float32(freq), dims)
    return jnp.concatenate([jnp.sin(angle), jnp.cos(angle)], axis=-1)[None]


def _reference_f64(max_length, dim, freq=10000.0):
    """float64 (numpy, host) ground truth."""
    positions = np.arange(max_length, dtype=np.float64)[:, None]
    dims = np.arange(0, dim, 2, dtype=np.float64)[None, :] / (dim - 2)
    angle = positions / np.power(np.float64(freq), dims)
    return np.concatenate([np.sin(angle), np.cos(angle)], axis=-1)[None]


if __name__ == "__main__":
    key = jax.random.PRNGKey(0)

    # --- Small shape consistent with the module's forward (only shape[1] matters).
    batch, seq_len, dim = 2, 8, 32
    x = jax.random.normal(key, (batch, seq_len, dim), dtype=jnp.float32)

    module = PositionEmbedding(dim=dim, freq=10000.0)
    out = jax.block_until_ready(module(x))
    assert out.shape == (1, seq_len, dim), out.shape
    assert np.allclose(np.asarray(out), _reference_f64(seq_len, dim), atol=1e-5, rtol=1e-5)
    assert jnp.allclose(out, _reference_f32(seq_len, dim), atol=1e-5, rtol=1e-5)

    # Second call hits the cache (no kernel relaunch).
    out2 = module(x)
    assert jnp.array_equal(out2, out)

    # --- Multi-tile case, dim >= 256 (two grid programs, both halves lane-aligned).
    L2, D2 = 1040, 256
    out_big = jax.block_until_ready(position_embedding_table(L2, D2))
    assert out_big.shape == (1, L2, D2), out_big.shape
    # Kernel is within a few f32 ulps of the float64 truth.
    assert np.allclose(np.asarray(out_big), _reference_f64(L2, D2), atol=1e-5, rtol=1e-5)
    # The f32 reference quantizes the angle (pos/freq**d) to f32 before sin/cos,
    # so it deviates from the truth by up to ~ulp(angle)/2 ~ 3e-5 at pos ~ 1e3;
    # compare against it at a tolerance that covers that quantization.
    assert np.allclose(np.asarray(out_big), np.asarray(_reference_f32(L2, D2)),
                       atol=1e-4, rtol=0.0)

    # --- Partial edge tile + dim < 256 (exercises the fused full-width store path).
    L3, D3 = 1000, 128
    out_small_dim = jax.block_until_ready(position_embedding_table(L3, D3))
    assert out_small_dim.shape == (1, L3, D3), out_small_dim.shape
    assert np.allclose(np.asarray(out_small_dim), _reference_f64(L3, D3),
                       atol=1e-5, rtol=1e-5)

    print("KERNEL_OK")
</pallas_src>

<mosaic_0001>
module attributes {stable_mosaic.version = 11 : i64} {
  func.func @_pos_embedding_kernel(%arg0: i32, %arg1: memref<1x1x32xf32, #tpu.memory_space<vmem>>, %arg2: memref<1x1x32xf32, #tpu.memory_space<vmem>>, %arg3: memref<8x32xf32, #tpu.memory_space<vmem>>, %arg4: memref<8x32xf32, #tpu.memory_space<vmem>>, %arg5: memref<1x8x32xf32, #tpu.memory_space<vmem>>) attributes {dimension_semantics = [#tpu.dimension_semantics<parallel>], iteration_bounds = array<i64: 1>, scalar_prefetch = 0 : i64, scratch_operands = 0 : i64, tpu.core_type = #tpu.core_type<tc>, window_params = [{transform_indices = @transform_0, window_bounds = array<i64: 1, 1, 32>}, {transform_indices = @transform_1, window_bounds = array<i64: 1, 1, 32>}, {pipeline_mode = #tpu.pipeline_mode<synchronous>, transform_indices = @transform_2, window_bounds = array<i64: 8, 32>}, {pipeline_mode = #tpu.pipeline_mode<synchronous>, transform_indices = @transform_3, window_bounds = array<i64: 8, 32>}, {transform_indices = @transform_4, window_bounds = array<i64: 1, 8, 32>}]} {
    %c0 = arith.constant 0 : index
    %c0_0 = arith.constant 0 : index
    %c0_1 = arith.constant 0 : index
    %0 = vector.load %arg1[%c0, %c0_0, %c0_1] : memref<1x1x32xf32, #tpu.memory_space<vmem>>, vector<1x1x32xf32>
    %1 = vector.shape_cast %0 : vector<1x1x32xf32> to vector<1x32xf32>
    %c0_2 = arith.constant 0 : index
    %c0_3 = arith.constant 0 : index
    %2 = vector.load %arg3[%c0_2, %c0_3] : memref<8x32xf32, #tpu.memory_space<vmem>>, vector<8x32xf32>
    %3 = vector.broadcast %1 : vector<1x32xf32> to vector<8x32xf32>
    %4 = arith.mulf %3, %2 : vector<8x32xf32>
    %c0_4 = arith.constant 0 : index
    %c0_5 = arith.constant 0 : index
    %c0_6 = arith.constant 0 : index
    %5 = vector.load %arg2[%c0_4, %c0_5, %c0_6] : memref<1x1x32xf32, #tpu.memory_space<vmem>>, vector<1x1x32xf32>
    %6 = vector.shape_cast %5 : vector<1x1x32xf32> to vector<1x32xf32>
    %c0_7 = arith.constant 0 : index
    %c0_8 = arith.constant 0 : index
    %7 = vector.load %arg4[%c0_7, %c0_8] : memref<8x32xf32, #tpu.memory_space<vmem>>, vector<8x32xf32>
    %8 = vector.broadcast %6 : vector<1x32xf32> to vector<8x32xf32>
    %9 = arith.mulf %8, %7 : vector<8x32xf32>
    %10 = arith.addf %4, %9 : vector<8x32xf32>
    %c0_9 = arith.constant 0 : index
    %c0_10 = arith.constant 0 : index
    %c0_11 = arith.constant 0 : index
    %11 = vector.load %arg5[%c0_9, %c0_10, %c0_11] : memref<1x8x32xf32, #tpu.memory_space<vmem>>, vector<1x8x32xf32>
    %12 = vector.shape_cast %11 : vector<1x8x32xf32> to vector<8x32xf32>
    %13 = vector.shape_cast %10 : vector<8x32xf32> to vector<1x8x32xf32>
    tpu.vector_store %arg5[%c0_9, %c0_10, %c0_11], %13 {strides = array<i32>} : memref<1x8x32xf32, #tpu.memory_space<vmem>>, vector<1x8x32xf32>,
    return
  }
  func.func @transform_0(%arg0: i32) -> (i32, i32, i32) {
    %c0_i32 = arith.constant 0 : i32
    %c0_i32_0 = arith.constant 0 : i32
    %c0_i32_1 = arith.constant 0 : i32
    return %arg0, %c0_i32, %c0_i32_0 : i32, i32, i32
  }
  func.func @transform_1(%arg0: i32) -> (i32, i32, i32) {
    %c0_i32 = arith.constant 0 : i32
    %c0_i32_0 = arith.constant 0 : i32
    %c0_i32_1 = arith.constant 0 : i32
    return %arg0, %c0_i32, %c0_i32_0 : i32, i32, i32
  }
  func.func @transform_2(%arg0: i32) -> (i32, i32) {
    %c0_i32 = arith.constant 0 : i32
    %c0_i32_0 = arith.constant 0 : i32
    %c0_i32_1 = arith.constant 0 : i32
    return %c0_i32, %c0_i32_0 : i32, i32
  }
  func.func @transform_3(%arg0: i32) -> (i32, i32) {
    %c0_i32 = arith.constant 0 : i32
    %c0_i32_0 = arith.constant 0 : i32
    %c0_i32_1 = arith.constant 0 : i32
    return %c0_i32, %c0_i32_0 : i32, i32
  }
  func.func @transform_4(%arg0: i32) -> (i32, i32, i32) {
    %c0_i32 = arith.constant 0 : i32
    %c0_i32_0 = arith.constant 0 : i32
    %c0_i32_1 = arith.constant 0 : i32
    return %c0_i32, %arg0, %c0_i32_0 : i32, i32, i32
  }
}

</mosaic_0001>

<bundles_post_ra>
// kernel: tpu_custom_call.1
= control target key start
LH: loop header
LB: loop body
LE: loop exit
PB: predicated region body
PF: predicated region fallthrough
CT: control target
= control target key end

     0   :  { %9 = vsyncpa [#allocation3], 0  ;;  %s226_s0 = inlined_call_operand.hbm [shape: f32[1,1,32], index: 0, kind: input, shape index: {}]   ;;  %s227_s1 = inlined_call_operand.vmem [shape: f32[1,1,32], index: 1, kind: input, shape index: {}]   ;;  %s228_s2 = inlined_call_operand.hbm [shape: f32[8,32], index: 2, kind: input, shape index: {}]   ;;  %s229_s3 = inlined_call_operand.hbm [shape: f32[8,32], index: 3, kind: input, shape index: {}]   ;;  %s230_s4 = inlined_call_operand.hbm [shape: f32[1,8,32], index: 4, kind: output, shape index: {}]  }
   0x1   :  { %10 = vsyncpa [#allocation6], 0 }
   0x2   :  { %11 = vsyncpa [#allocation4], 0  ;;  %s182_s15 = smov [#allocation5]   ;;  %s183_s17 = smov [#allocation2]  }
   0x3   :  { %s30_s16 = sshll.u32 %s182_s15, 4  ;;  %s18_s18 = sshll.u32 %s183_s17, 4  ;;  %s31_s16 = int_to_ptr.vmem [resolvable:$true] %s30_s16  ;;  %s19_s18 = int_to_ptr.vmem [resolvable:$true] %s18_s18 }
   0x4   :  { %s104_s19 = scalar_lea.vmem %s31_s16, 128  ;;  %p109_p1 = scmp.lt.s32.totalorder %s31_s16, %s31_s16 }
   0x5   :  { %p105_p0 = scmp.ne.s32.totalorder %s31_s16, %s104_s19  ;;  %p110_p2 = scmp.lt.s32.totalorder %s104_s19, %s104_s19 }
   0x7   :  { %p111_p3 = por %p110_p2, %p109_p1 }
   0x9   :  { %p112_p4 = pnand %p111_p3, %p105_p0 }
   0xb   :  { %115 = shalt.err (!%p112_p4)
}
   0xc   :  { %33 = dma.hbm_to_vmem [thread:$0]  %s228_s2, 128, %s31_s16, [#allocation6]  }
   0xd   :  { %s124_s22 = scalar_lea.vmem %s19_s18, 16  ;;  %s128_s23 = scalar_lea.vmem %s19_s18, 32 }
   0xe   :  { %p125_p5 = scmp.ne.s32.totalorder %s19_s18, %s124_s22  ;;  %p129_p6 = scmp.lt.s32.totalorder %s19_s18, %s19_s18 }
   0xf   :  { %p130_p7 = scmp.lt.s32.totalorder %s128_s23, %s124_s22 }
  0x11   :  { %p131_p8 = por %p130_p7, %p129_p6 }
  0x13   :  { %p132_p9 = pnand %p131_p8, %p125_p5 }
  0x15   :  { %135 = shalt.err (!%p132_p9)
}
  0x16   :  { %21 = dma.hbm_to_vmem [thread:$0]  %s226_s0, 16, %s19_s18, [#allocation3]  }
  0x17   :  { %s184_s26 = smov [#allocation7]  }
  0x18   :  { %s40_s27 = sshll.u32 %s184_s26, 4  ;;  %s41_s27 = int_to_ptr.vmem [resolvable:$true] %s40_s27 }
  0x19   :  { %s144_s28 = scalar_lea.vmem %s41_s27, 128  ;;  %p149_p11 = scmp.lt.s32.totalorder %s41_s27, %s41_s27 }
  0x1a   :  { %p145_p10 = scmp.ne.s32.totalorder %s41_s27, %s144_s28  ;;  %p150_p12 = scmp.lt.s32.totalorder %s144_s28, %s144_s28 }
  0x1c   :  { %p151_p13 = por %p150_p12, %p149_p11 }
  0x1e   :  { %p152_p0 = pnand %p151_p13, %p145_p10 }
  0x20   :  { %155 = shalt.err (!%p152_p0)
}
  0x21   :  { %43 = dma.hbm_to_vmem [thread:$0]  %s229_s3, 128, %s41_s27, [#allocation6]  }
  0x22   :  { %176 = dma.done.wait [#allocation3], 16  }
  0x23   :  { %177 = vsyncadd [#allocation3], 4294967280 }
  0x24   :  { %178 = dma.done.wait [#allocation6], 256  }
  0x25   :  { %179 = vsyncadd [#allocation6], 4294967040  ;;  %v90_v0 = vld [vmem:[#allocation2] ss:$0 sm:$0xff]  ;;  %v54_v1 = vld [vmem:[#allocation5] sm:$0xff]  ;;  %s185_s5 = smov [#allocation8]  }
  0x26   :  { %v91_v2 = vld [vmem:[%s227_s1] ss:$0 sm:$0xff]  ;;  %v61_v3 = vmul.f32 %v90_v0, %v54_v1  ;;  %v63_v4 = vld [vmem:[#allocation7] sm:$0xff]  ;;  %s80_s6 = sshll.u32 %s185_s5, 4  ;;  %vm72_vm0 = vcmask 261120   ;;  %s81_s6 = int_to_ptr.vmem [resolvable:$true] %s80_s6 }
  0x27   :  { %v70_v5 = vmul.f32 %v91_v2, %v63_v4  ;;  %s156_s3 = scalar_lea.vmem %s81_s6, 128  ;;  %p161_p2 = scmp.lt.s32.totalorder %s81_s6, %s81_s6 }
  0x28   :  { %p157_p1 = scmp.ne.s32.totalorder %s81_s6, %s156_s3  ;;  %p162_p3 = scmp.lt.s32.totalorder %s156_s3, %s156_s3 }
  0x29   :  { %v71_v6 = vadd.f32 %v70_v5, %v61_v3 }
  0x2a   :  { %p163_p4 = por %p162_p3, %p161_p2 }
  0x2b   :  { %73 = vst.msk [vmem:[#allocation8] sm:$0xff] %vm72_vm0, %v71_v6 }
  0x2c   :  { %p164_p5 = pnand %p163_p4, %p157_p1 }
  0x2e   :  { %167 = shalt.err (!%p164_p5)
}
  0x2f   :  { %83 = dma.vmem_to_hbm [thread:$0]  %s81_s6, 128, %s230_s4, [#allocation4]  }
  0x30   :  { %180 = dma.done.wait [#allocation4], 128  }
  0x31   :  { %181 = vsyncadd [#allocation4], 4294967168 }
  0x32   :  { %87 = vsyncpa [#allocation3], 1 }
  0x33   :  { %88 = vsyncpa [#allocation6], 1 }
  0x34   :  { %89 = vsyncpa [#allocation4], 1 }

</bundles_post_ra>
